<compile_context>
chip_gen: v7x
topology: tpu7x:2x2x1
jax: 0.10.0
libtpu: 0.0.40
codegen_flags: <defaults>
</compile_context>

<pallas_src>
import functools

import jax
import jax.numpy as jnp
from jax.experimental import pallas as pl
from jax.experimental.pallas import tpu as pltpu

_PER_LAYER_INPUTS = 5  # bw, pw, p0_bias, ln_gamma, ln_beta


# ----------------------------------------------------------------------------
# Fused kernel: the entire KAL_Net forward (all layers) in one pallas_call.
# refs = (x, [bw, pw, p0b, gamma, beta] * n_layers, out); everything in VMEM.
# ----------------------------------------------------------------------------
def _kal_net_kernel(*refs, order, num_layers):
    x_ref = refs[0]
    o_ref = refs[-1]
    w_refs = refs[1:-1]

    x = x_ref[...]                                   # (B, Din0) f32

    for li in range(num_layers):
        bw_ref = w_refs[_PER_LAYER_INPUTS * li + 0]  # (Din, Dout)
        pw_ref = w_refs[_PER_LAYER_INPUTS * li + 1]  # (order, Din, Dout)
        p0b = w_refs[_PER_LAYER_INPUTS * li + 2][...]  # (1, Dout) f32
        g = w_refs[_PER_LAYER_INPUTS * li + 3][...]    # (1, Dout) f32
        b = w_refs[_PER_LAYER_INPUTS * li + 4][...]    # (1, Dout) f32
        wdtype = bw_ref.dtype                          # f32 or bf16

        # ---- base branch: SiLU(x) @ W_base^T (weights pre-transposed) ------
        silu_x = x * jax.nn.sigmoid(x)
        base = jnp.dot(silu_x.astype(wdtype), bw_ref[...],
                       preferred_element_type=jnp.float32)

        # Global min/max rescale of base_output to [-1, 1] (in the reference).
        # Scalar reciprocal-style factor + one FMA per element, no vector div.
        bmin = jnp.min(base)
        bmax = jnp.max(base)
        s_b = 2.0 / (bmax - bmin)
        base = base * s_b - (bmin * s_b + 1.0)

        # Global min/max rescale of x to [-1, 1].
        xmin = jnp.min(x)
        xmax = jnp.max(x)
        s_x = 2.0 / (xmax - xmin)
        xn = x * s_x - (xmin * s_x + 1.0)

        # ---- poly branch: Legendre recurrence + per-order accumulated dots -
        # P0 (all ones) is folded into the precomputed bias p0b, so the k-th
        # MXU dot issues as soon as P_k leaves the VPU recurrence, and the
        # poly weights carry only orders 1..order (exact logical K = Din).
        p_prev = jnp.ones_like(xn)          # P0
        p_cur = xn                          # P1
        poly = p0b + jnp.dot(p_cur.astype(wdtype), pw_ref[0],
                             preferred_element_type=jnp.float32)
        for n in range(1, order):
            p_next = ((2.0 * n + 1.0) * xn * p_cur - n * p_prev) * (1.0 / (n + 1.0))
            p_prev, p_cur = p_cur, p_next
            poly = poly + jnp.dot(p_cur.astype(wdtype), pw_ref[n],
                                  preferred_element_type=jnp.float32)

        # ---- LayerNorm(out_features, eps=1e-5) + SiLU -----------------------
        y = base + poly
        mu = jnp.mean(y, axis=-1, keepdims=True)
        d = y - mu
        var = jnp.mean(d * d, axis=-1, keepdims=True)
        yhat = d * jax.lax.rsqrt(var + 1e-5) * g + b
        x = yhat * jax.nn.sigmoid(yhat)

    o_ref[...] = x


# ----------------------------------------------------------------------------
# Parameter init (PyTorch layout) + one-time pre-layout for the kernel.
# ----------------------------------------------------------------------------
def init_kal_params(key, layers_hidden, order=3):
    """Raw PyTorch-layout params per layer:
    base_w (out, in), poly_w (out, in*(order+1)), ln_w (out,), ln_b (out,)."""
    params = []
    for in_f, out_f in zip(layers_hidden, layers_hidden[1:]):
        key, k1, k2 = jax.random.split(key, 3)
        bound_b = (3.0 / in_f) ** 0.5                       # kaiming_uniform(linear)
        base_w = jax.random.uniform(k1, (out_f, in_f), jnp.float32, -bound_b, bound_b)
        fan_in_p = in_f * (order + 1)
        bound_p = (3.0 / fan_in_p) ** 0.5
        poly_w = jax.random.uniform(k2, (out_f, fan_in_p), jnp.float32, -bound_p, bound_p)
        ln_w = jnp.ones((out_f,), jnp.float32)
        ln_b = jnp.zeros((out_f,), jnp.float32)
        params.append((base_w, poly_w, ln_w, ln_b))
    return params


def prepare_params(params, order=3, weight_dtype=jnp.float32):
    """ONE-TIME weight re-layout (no zero padding — exact logical shapes).

    base_w (Dout, Din)        -> bw  (Din, Dout)            transposed
    poly_w (Dout, Din*(P+1))  -> pw  (P, Din, Dout)          order-major, P0 dropped
                                  p0b (1, Dout)              precomputed P0 bias
    ln_w / ln_b (Dout,)       -> (1, Dout) f32
    bw / pw may be stored in bf16 (MXU-native); p0b / LN params stay f32.
    """
    assert order >= 1, "polynomial_order must be >= 1 for this kernel"
    prepped = []
    for base_w, poly_w, ln_w, ln_b in params:
        Dout, Din = base_w.shape
        bw = base_w.T.astype(weight_dtype)                         # (Din, Dout)
        # poly_w columns are feature-major / order-minor (matches the PyTorch
        # view() flattening of the stacked basis): col = d*(order+1) + k.
        pw3 = poly_w.reshape(Dout, Din, order + 1).transpose(2, 1, 0)  # (P+1, Din, Dout)
        p0b = jnp.sum(pw3[0], axis=0, keepdims=True)               # (1, Dout) f32
        pw = pw3[1:].astype(weight_dtype)                          # (order, Din, Dout)
        g = ln_w.reshape(1, Dout).astype(jnp.float32)
        b = ln_b.reshape(1, Dout).astype(jnp.float32)
        prepped.append(dict(bw=bw, pw=pw, p0b=p0b, g=g, b=b, Din=Din, Dout=Dout))
    return prepped


def _vmem_limit_bytes(need_bytes):
    """Generation-aware VMEM limit: sized from the real working set, capped
    below the physical VMEM of the current chip (64 MiB v7x, 128 MiB v5e/v6e)."""
    try:
        cap = int(pltpu.get_tpu_info().vmem_capacity_bytes)
    except Exception:
        cap = 64 << 20                      # conservative fallback (v7x size)
    cap = (cap * 3) // 4                    # headroom for compiler temporaries
    want = 2 * int(need_bytes) + (2 << 20)  # live copies + slack
    return min(max(want, 16 << 20), cap)


def kal_net_forward(x, prepped, order=3):
    """x: (..., layers_hidden[0]) float. prepped: output of prepare_params()."""
    orig_shape = x.shape
    Din0 = orig_shape[-1]
    assert Din0 == prepped[0]["Din"]
    x2 = x.reshape(-1, Din0).astype(jnp.float32)
    B = x2.shape[0]
    Dout_last = prepped[-1]["Dout"]

    inputs = [x2]
    for lp in prepped:
        inputs += [lp["bw"], lp["pw"], lp["p0b"], lp["g"], lp["b"]]

    vmem = pl.BlockSpec(memory_space=pltpu.MemorySpace.VMEM)

    # Working set: all resident inputs/outputs + per-layer f32 temporaries
    # (each small array still occupies at least one (8,128) tile in VMEM).
    io_bytes = sum(int(a.size) * a.dtype.itemsize for a in inputs)
    io_bytes += B * Dout_last * 4
    max_feat = max(max(lp["Din"], lp["Dout"]) for lp in prepped)
    tmp_bytes = 12 * max(B, 8) * max(max_feat, 128) * 4
    vmem_limit = _vmem_limit_bytes(io_bytes + tmp_bytes)

    # TODO(synk): for batches too large to keep resident, tile the batch axis
    # with a ("parallel",) grid (engages both TensorCores on v7x) and make the
    # per-layer global min/max a two-pass / cross-core reduction — the global
    # reductions couple all batch tiles, so naive tiling would change the math.
    # TODO(synk): for deep/wide nets whose weights dwarf VMEM, keep later-layer
    # weights in memory_space=pl.ANY and double-buffer them in-kernel with
    # pltpu.make_async_copy so layer i+1's weight DMA hides under layer i.
    out = pl.pallas_call(
        functools.partial(_kal_net_kernel, order=order, num_layers=len(prepped)),
        out_shape=jax.ShapeDtypeStruct((B, Dout_last), jnp.float32),
        in_specs=[vmem] * len(inputs),
        out_specs=vmem,
        compiler_params=pltpu.CompilerParams(vmem_limit_bytes=vmem_limit),
    )(*inputs)

    return out.reshape(*orig_shape[:-1], Dout_last)


# ----------------------------------------------------------------------------
# Pure-JAX reference (mirrors the PyTorch forward literally) for validation.
# ----------------------------------------------------------------------------
def _reference_forward(x, params, order):
    x = x.astype(jnp.float32)
    hp = jax.lax.Precision.HIGHEST
    for base_w, poly_w, ln_w, ln_b in params:
        base = jnp.dot(x * jax.nn.sigmoid(x), base_w.T, precision=hp)
        base = 2.0 * (base - jnp.min(base)) / (jnp.max(base) - jnp.min(base)) - 1.0
        xn = 2.0 * (x - jnp.min(x)) / (jnp.max(x) - jnp.min(x)) - 1.0
        polys = [jnp.ones_like(xn), xn]
        for n in range(1, order):
            polys.append(((2.0 * n + 1.0) * xn * polys[-1] - n * polys[-2]) / (n + 1.0))
        basis = jnp.stack(polys, axis=-1).reshape(x.shape[0], -1)   # feature-major
        poly = jnp.dot(basis, poly_w.T, precision=hp)
        y = base + poly
        mu = jnp.mean(y, axis=-1, keepdims=True)
        var = jnp.mean((y - mu) ** 2, axis=-1, keepdims=True)
        y = (y - mu) / jnp.sqrt(var + 1e-5) * ln_w + ln_b
        x = y * jax.nn.sigmoid(y)
    return x


if __name__ == "__main__":
    layers_hidden = [16, 32, 8]
    polynomial_order = 3
    batch = 8

    key = jax.random.PRNGKey(0)
    key, kx = jax.random.split(key)
    x = jax.random.normal(kx, (batch, layers_hidden[0]), jnp.float32)

    params = init_kal_params(key, layers_hidden, polynomial_order)
    prepped = prepare_params(params, polynomial_order)        # one-time re-layout

    out = kal_net_forward(x, prepped, order=polynomial_order)
    out = jax.block_until_ready(out)
    assert out.shape == (batch, layers_hidden[-1])
    assert out.dtype == jnp.float32

    # Validate against the pure-JAX reference of the PyTorch forward.
    ref = jax.block_until_ready(_reference_forward(x, params, polynomial_order))
    max_err = float(jnp.max(jnp.abs(out - ref)))
    assert max_err < 1e-2, f"kernel vs reference mismatch: max abs err = {max_err}"

    # bf16 weight storage path (halves weight DMA/VMEM; f32 accumulation):
    # just verify it compiles, runs and stays finite.
    prepped_bf16 = prepare_params(params, polynomial_order, weight_dtype=jnp.bfloat16)
    out_bf16 = jax.block_until_ready(
        kal_net_forward(x, prepped_bf16, order=polynomial_order))
    assert bool(jnp.all(jnp.isfinite(out_bf16)))

    print("KERNEL_OK")
</pallas_src>

<mosaic_0001>
module attributes {stable_mosaic.version = 11 : i64} {
  func.func @_kal_net_kernel(%arg0: memref<8x16xf32, #tpu.memory_space<vmem>>, %arg1: memref<16x32xf32, #tpu.memory_space<vmem>>, %arg2: memref<3x16x32xf32, #tpu.memory_space<vmem>>, %arg3: memref<1x32xf32, #tpu.memory_space<vmem>>, %arg4: memref<1x32xf32, #tpu.memory_space<vmem>>, %arg5: memref<1x32xf32, #tpu.memory_space<vmem>>, %arg6: memref<32x8xf32, #tpu.memory_space<vmem>>, %arg7: memref<3x32x8xf32, #tpu.memory_space<vmem>>, %arg8: memref<1x8xf32, #tpu.memory_space<vmem>>, %arg9: memref<1x8xf32, #tpu.memory_space<vmem>>, %arg10: memref<1x8xf32, #tpu.memory_space<vmem>>, %arg11: memref<8x8xf32, #tpu.memory_space<vmem>>) attributes {dimension_semantics = [], scalar_prefetch = 0 : i64, scratch_operands = 0 : i64, tpu.core_type = #tpu.core_type<tc>} {
    %c0 = arith.constant 0 : index
    %c0_0 = arith.constant 0 : index
    %0 = vector.load %arg0[%c0, %c0_0] : memref<8x16xf32, #tpu.memory_space<vmem>>, vector<8x16xf32>
    %c0_1 = arith.constant 0 : index
    %c0_2 = arith.constant 0 : index
    %1 = vector.load %arg3[%c0_1, %c0_2] : memref<1x32xf32, #tpu.memory_space<vmem>>, vector<1x32xf32>
    %c0_3 = arith.constant 0 : index
    %c0_4 = arith.constant 0 : index
    %2 = vector.load %arg4[%c0_3, %c0_4] : memref<1x32xf32, #tpu.memory_space<vmem>>, vector<1x32xf32>
    %c0_5 = arith.constant 0 : index
    %c0_6 = arith.constant 0 : index
    %3 = vector.load %arg5[%c0_5, %c0_6] : memref<1x32xf32, #tpu.memory_space<vmem>>, vector<1x32xf32>
    %4 = arith.negf %0 : vector<8x16xf32>
    %5 = math.exp %4 : vector<8x16xf32>
    %cst = arith.constant 1.000000e+00 : f32
    %6 = vector.broadcast %cst : f32 to vector<8x16xf32>
    %7 = arith.addf %6, %5 : vector<8x16xf32>
    %8 = arith.divf %6, %7 : vector<8x16xf32>
    %9 = arith.mulf %0, %8 : vector<8x16xf32>
    %c0_7 = arith.constant 0 : index
    %c0_8 = arith.constant 0 : index
    %10 = vector.load %arg1[%c0_7, %c0_8] : memref<16x32xf32, #tpu.memory_space<vmem>>, vector<16x32xf32>
    %cst_9 = arith.constant dense<0.000000e+00> : vector<8x32xf32>
    %11 = tpu.matmul %9, %10, %cst_9 {dimension_numbers = #tpu.dot_dimension_numbers<[1], [0], [0], [1], [0, 0, 1, 1], [], []>} : vector<8x16xf32>, vector<16x32xf32>, vector<8x32xf32> -> vector<8x32xf32>
    %12 = vector.shape_cast %11 : vector<8x32xf32> to vector<1x8x32xf32>
    %cst_10 = arith.constant dense<0x7F800000> : vector<1xf32>
    %13 = vector.multi_reduction <minimumf>, %12, %cst_10 [1, 2] : vector<1x8x32xf32> to vector<1xf32>
    %14 = vector.shape_cast %13 : vector<1xf32> to vector<1x1x1xf32>
    %15 = vector.extract %14[0, 0, 0] : f32 from vector<1x1x1xf32>
    %16 = vector.shape_cast %11 : vector<8x32xf32> to vector<1x8x32xf32>
    %cst_11 = arith.constant dense<0xFF800000> : vector<1xf32>
    %17 = vector.multi_reduction <maximumf>, %16, %cst_11 [1, 2] : vector<1x8x32xf32> to vector<1xf32>
    %18 = vector.shape_cast %17 : vector<1xf32> to vector<1x1x1xf32>
    %19 = vector.extract %18[0, 0, 0] : f32 from vector<1x1x1xf32>
    %20 = arith.subf %19, %15 : f32
    %cst_12 = arith.constant 2.000000e+00 : f32
    %21 = arith.divf %cst_12, %20 : f32
    %22 = vector.broadcast %21 : f32 to vector<8x32xf32>
    %23 = arith.mulf %11, %22 : vector<8x32xf32>
    %24 = arith.mulf %15, %21 : f32
    %cst_13 = arith.constant 1.000000e+00 : f32
    %25 = arith.addf %24, %cst_13 : f32
    %26 = vector.broadcast %25 : f32 to vector<8x32xf32>
    %27 = arith.subf %23, %26 : vector<8x32xf32>
    %28 = vector.shape_cast %0 : vector<8x16xf32> to vector<1x8x16xf32>
    %cst_14 = arith.constant dense<0x7F800000> : vector<1xf32>
    %29 = vector.multi_reduction <minimumf>, %28, %cst_14 [1, 2] : vector<1x8x16xf32> to vector<1xf32>
    %30 = vector.shape_cast %29 : vector<1xf32> to vector<1x1x1xf32>
    %31 = vector.extract %30[0, 0, 0] : f32 from vector<1x1x1xf32>
    %32 = vector.shape_cast %0 : vector<8x16xf32> to vector<1x8x16xf32>
    %cst_15 = arith.constant dense<0xFF800000> : vector<1xf32>
    %33 = vector.multi_reduction <maximumf>, %32, %cst_15 [1, 2] : vector<1x8x16xf32> to vector<1xf32>
    %34 = vector.shape_cast %33 : vector<1xf32> to vector<1x1x1xf32>
    %35 = vector.extract %34[0, 0, 0] : f32 from vector<1x1x1xf32>
    %36 = arith.subf %35, %31 : f32
    %cst_16 = arith.constant 2.000000e+00 : f32
    %37 = arith.divf %cst_16, %36 : f32
    %38 = vector.broadcast %37 : f32 to vector<8x16xf32>
    %39 = arith.mulf %0, %38 : vector<8x16xf32>
    %40 = arith.mulf %31, %37 : f32
    %cst_17 = arith.constant 1.000000e+00 : f32
    %41 = arith.addf %40, %cst_17 : f32
    %42 = vector.broadcast %41 : f32 to vector<8x16xf32>
    %43 = arith.subf %39, %42 : vector<8x16xf32>
    %cst_18 = arith.constant 1.000000e+00 : f32
    %44 = vector.broadcast %cst_18 : f32 to vector<8x16xf32>
    %c0_19 = arith.constant 0 : index
    %c0_20 = arith.constant 0 : index
    %c0_21 = arith.constant 0 : index
    %45 = vector.load %arg2[%c0_19, %c0_20, %c0_21] : memref<3x16x32xf32, #tpu.memory_space<vmem>>, vector<1x16x32xf32>
    %46 = vector.shape_cast %45 : vector<1x16x32xf32> to vector<16x32xf32>
    %cst_22 = arith.constant dense<0.000000e+00> : vector<8x32xf32>
    %47 = tpu.matmul %43, %46, %cst_22 {dimension_numbers = #tpu.dot_dimension_numbers<[1], [0], [0], [1], [0, 0, 1, 1], [], []>} : vector<8x16xf32>, vector<16x32xf32>, vector<8x32xf32> -> vector<8x32xf32>
    %48 = vector.broadcast %1 : vector<1x32xf32> to vector<8x32xf32>
    %49 = arith.addf %48, %47 : vector<8x32xf32>
    %cst_23 = arith.constant 3.000000e+00 : f32
    %50 = vector.broadcast %cst_23 : f32 to vector<8x16xf32>
    %51 = arith.mulf %50, %43 : vector<8x16xf32>
    %52 = arith.mulf %51, %43 : vector<8x16xf32>
    %cst_24 = arith.constant 1.000000e+00 : f32
    %53 = vector.broadcast %cst_24 : f32 to vector<8x16xf32>
    %54 = arith.mulf %53, %44 : vector<8x16xf32>
    %55 = arith.subf %52, %54 : vector<8x16xf32>
    %cst_25 = arith.constant 5.000000e-01 : f32
    %56 = vector.broadcast %cst_25 : f32 to vector<8x16xf32>
    %57 = arith.mulf %55, %56 : vector<8x16xf32>
    %c1 = arith.constant 1 : index
    %c0_26 = arith.constant 0 : index
    %c0_27 = arith.constant 0 : index
    %58 = vector.load %arg2[%c1, %c0_26, %c0_27] : memref<3x16x32xf32, #tpu.memory_space<vmem>>, vector<1x16x32xf32>
    %59 = vector.shape_cast %58 : vector<1x16x32xf32> to vector<16x32xf32>
    %cst_28 = arith.constant dense<0.000000e+00> : vector<8x32xf32>
    %60 = tpu.matmul %57, %59, %cst_28 {dimension_numbers = #tpu.dot_dimension_numbers<[1], [0], [0], [1], [0, 0, 1, 1], [], []>} : vector<8x16xf32>, vector<16x32xf32>, vector<8x32xf32> -> vector<8x32xf32>
    %61 = arith.addf %49, %60 : vector<8x32xf32>
    %cst_29 = arith.constant 5.000000e+00 : f32
    %62 = vector.broadcast %cst_29 : f32 to vector<8x16xf32>
    %63 = arith.mulf %62, %43 : vector<8x16xf32>
    %64 = arith.mulf %63, %57 : vector<8x16xf32>
    %cst_30 = arith.constant 2.000000e+00 : f32
    %65 = vector.broadcast %cst_30 : f32 to vector<8x16xf32>
    %66 = arith.mulf %65, %43 : vector<8x16xf32>
    %67 = arith.subf %64, %66 : vector<8x16xf32>
    %cst_31 = arith.constant 0.333333343 : f32
    %68 = vector.broadcast %cst_31 : f32 to vector<8x16xf32>
    %69 = arith.mulf %67, %68 : vector<8x16xf32>
    %c2 = arith.constant 2 : index
    %c0_32 = arith.constant 0 : index
    %c0_33 = arith.constant 0 : index
    %70 = vector.load %arg2[%c2, %c0_32, %c0_33] : memref<3x16x32xf32, #tpu.memory_space<vmem>>, vector<1x16x32xf32>
    %71 = vector.shape_cast %70 : vector<1x16x32xf32> to vector<16x32xf32>
    %cst_34 = arith.constant dense<0.000000e+00> : vector<8x32xf32>
    %72 = tpu.matmul %69, %71, %cst_34 {dimension_numbers = #tpu.dot_dimension_numbers<[1], [0], [0], [1], [0, 0, 1, 1], [], []>} : vector<8x16xf32>, vector<16x32xf32>, vector<8x32xf32> -> vector<8x32xf32>
    %73 = arith.addf %61, %72 : vector<8x32xf32>
    %74 = arith.addf %27, %73 : vector<8x32xf32>
    %cst_35 = arith.constant dense<0.000000e+00> : vector<8xf32>
    %75 = vector.multi_reduction <add>, %74, %cst_35 [1] : vector<8x32xf32> to vector<8xf32>
    %76 = vector.shape_cast %75 : vector<8xf32> to vector<8x1xf32>
    %cst_36 = arith.constant 3.200000e+01 : f32
    %77 = vector.broadcast %cst_36 : f32 to vector<8x1xf32>
    %78 = arith.divf %76, %77 : vector<8x1xf32>
    %79 = vector.broadcast %78 : vector<8x1xf32> to vector<8x32xf32>
    %80 = arith.subf %74, %79 : vector<8x32xf32>
    %81 = arith.mulf %80, %80 : vector<8x32xf32>
    %cst_37 = arith.constant dense<0.000000e+00> : vector<8xf32>
    %82 = vector.multi_reduction <add>, %81, %cst_37 [1] : vector<8x32xf32> to vector<8xf32>
    %83 = vector.shape_cast %82 : vector<8xf32> to vector<8x1xf32>
    %cst_38 = arith.constant 3.200000e+01 : f32
    %84 = vector.broadcast %cst_38 : f32 to vector<8x1xf32>
    %85 = arith.divf %83, %84 : vector<8x1xf32>
    %cst_39 = arith.constant 9.99999974E-6 : f32
    %86 = vector.broadcast %cst_39 : f32 to vector<8x1xf32>
    %87 = arith.addf %85, %86 : vector<8x1xf32>
    %88 = math.rsqrt %87 : vector<8x1xf32>
    %89 = vector.broadcast %88 : vector<8x1xf32> to vector<8x32xf32>
    %90 = arith.mulf %80, %89 : vector<8x32xf32>
    %91 = vector.broadcast %2 : vector<1x32xf32> to vector<8x32xf32>
    %92 = arith.mulf %90, %91 : vector<8x32xf32>
    %93 = vector.broadcast %3 : vector<1x32xf32> to vector<8x32xf32>
    %94 = arith.addf %92, %93 : vector<8x32xf32>
    %95 = arith.negf %94 : vector<8x32xf32>
    %96 = math.exp %95 : vector<8x32xf32>
    %cst_40 = arith.constant 1.000000e+00 : f32
    %97 = vector.broadcast %cst_40 : f32 to vector<8x32xf32>
    %98 = arith.addf %97, %96 : vector<8x32xf32>
    %99 = arith.divf %97, %98 : vector<8x32xf32>
    %100 = arith.mulf %94, %99 : vector<8x32xf32>
    %c0_41 = arith.constant 0 : index
    %c0_42 = arith.constant 0 : index
    %101 = vector.load %arg8[%c0_41, %c0_42] : memref<1x8xf32, #tpu.memory_space<vmem>>, vector<1x8xf32>
    %c0_43 = arith.constant 0 : index
    %c0_44 = arith.constant 0 : index
    %102 = vector.load %arg9[%c0_43, %c0_44] : memref<1x8xf32, #tpu.memory_space<vmem>>, vector<1x8xf32>
    %c0_45 = arith.constant 0 : index
    %c0_46 = arith.constant 0 : index
    %103 = vector.load %arg10[%c0_45, %c0_46] : memref<1x8xf32, #tpu.memory_space<vmem>>, vector<1x8xf32>
    %104 = arith.negf %100 : vector<8x32xf32>
    %105 = math.exp %104 : vector<8x32xf32>
    %cst_47 = arith.constant 1.000000e+00 : f32
    %106 = vector.broadcast %cst_47 : f32 to vector<8x32xf32>
    %107 = arith.addf %106, %105 : vector<8x32xf32>
    %108 = arith.divf %106, %107 : vector<8x32xf32>
    %109 = arith.mulf %100, %108 : vector<8x32xf32>
    %c0_48 = arith.constant 0 : index
    %c0_49 = arith.constant 0 : index
    %110 = vector.load %arg6[%c0_48, %c0_49] : memref<32x8xf32, #tpu.memory_space<vmem>>, vector<32x8xf32>
    %cst_50 = arith.constant dense<0.000000e+00> : vector<8x8xf32>
    %111 = tpu.matmul %109, %110, %cst_50 {dimension_numbers = #tpu.dot_dimension_numbers<[1], [0], [0], [1], [0, 0, 1, 1], [], []>} : vector<8x32xf32>, vector<32x8xf32>, vector<8x8xf32> -> vector<8x8xf32>
    %112 = vector.shape_cast %111 : vector<8x8xf32> to vector<1x8x8xf32>
    %cst_51 = arith.constant dense<0x7F800000> : vector<1xf32>
    %113 = vector.multi_reduction <minimumf>, %112, %cst_51 [1, 2] : vector<1x8x8xf32> to vector<1xf32>
    %114 = vector.shape_cast %113 : vector<1xf32> to vector<1x1x1xf32>
    %115 = vector.extract %114[0, 0, 0] : f32 from vector<1x1x1xf32>
    %116 = vector.shape_cast %111 : vector<8x8xf32> to vector<1x8x8xf32>
    %cst_52 = arith.constant dense<0xFF800000> : vector<1xf32>
    %117 = vector.multi_reduction <maximumf>, %116, %cst_52 [1, 2] : vector<1x8x8xf32> to vector<1xf32>
    %118 = vector.shape_cast %117 : vector<1xf32> to vector<1x1x1xf32>
    %119 = vector.extract %118[0, 0, 0] : f32 from vector<1x1x1xf32>
    %120 = arith.subf %119, %115 : f32
    %cst_53 = arith.constant 2.000000e+00 : f32
    %121 = arith.divf %cst_53, %120 : f32
    %122 = vector.broadcast %121 : f32 to vector<8x8xf32>
    %123 = arith.mulf %111, %122 : vector<8x8xf32>
    %124 = arith.mulf %115, %121 : f32
    %cst_54 = arith.constant 1.000000e+00 : f32
    %125 = arith.addf %124, %cst_54 : f32
    %126 = vector.broadcast %125 : f32 to vector<8x8xf32>
    %127 = arith.subf %123, %126 : vector<8x8xf32>
    %128 = vector.shape_cast %100 : vector<8x32xf32> to vector<1x8x32xf32>
    %cst_55 = arith.constant dense<0x7F800000> : vector<1xf32>
    %129 = vector.multi_reduction <minimumf>, %128, %cst_55 [1, 2] : vector<1x8x32xf32> to vector<1xf32>
    %130 = vector.shape_cast %129 : vector<1xf32> to vector<1x1x1xf32>
    %131 = vector.extract %130[0, 0, 0] : f32 from vector<1x1x1xf32>
    %132 = vector.shape_cast %100 : vector<8x32xf32> to vector<1x8x32xf32>
    %cst_56 = arith.constant dense<0xFF800000> : vector<1xf32>
    %133 = vector.multi_reduction <maximumf>, %132, %cst_56 [1, 2] : vector<1x8x32xf32> to vector<1xf32>
    %134 = vector.shape_cast %133 : vector<1xf32> to vector<1x1x1xf32>
    %135 = vector.extract %134[0, 0, 0] : f32 from vector<1x1x1xf32>
    %136 = arith.subf %135, %131 : f32
    %cst_57 = arith.constant 2.000000e+00 : f32
    %137 = arith.divf %cst_57, %136 : f32
    %138 = vector.broadcast %137 : f32 to vector<8x32xf32>
    %139 = arith.mulf %100, %138 : vector<8x32xf32>
    %140 = arith.mulf %131, %137 : f32
    %cst_58 = arith.constant 1.000000e+00 : f32
    %141 = arith.addf %140, %cst_58 : f32
    %142 = vector.broadcast %141 : f32 to vector<8x32xf32>
    %143 = arith.subf %139, %142 : vector<8x32xf32>
    %cst_59 = arith.constant 1.000000e+00 : f32
    %144 = vector.broadcast %cst_59 : f32 to vector<8x32xf32>
    %c0_60 = arith.constant 0 : index
    %c0_61 = arith.constant 0 : index
    %c0_62 = arith.constant 0 : index
    %145 = vector.load %arg7[%c0_60, %c0_61, %c0_62] : memref<3x32x8xf32, #tpu.memory_space<vmem>>, vector<1x32x8xf32>
    %146 = vector.shape_cast %145 : vector<1x32x8xf32> to vector<32x8xf32>
    %cst_63 = arith.constant dense<0.000000e+00> : vector<8x8xf32>
    %147 = tpu.matmul %143, %146, %cst_63 {dimension_numbers = #tpu.dot_dimension_numbers<[1], [0], [0], [1], [0, 0, 1, 1], [], []>} : vector<8x32xf32>, vector<32x8xf32>, vector<8x8xf32> -> vector<8x8xf32>
    %148 = vector.broadcast %101 : vector<1x8xf32> to vector<8x8xf32>
    %149 = arith.addf %148, %147 : vector<8x8xf32>
    %cst_64 = arith.constant 3.000000e+00 : f32
    %150 = vector.broadcast %cst_64 : f32 to vector<8x32xf32>
    %151 = arith.mulf %150, %143 : vector<8x32xf32>
    %152 = arith.mulf %151, %143 : vector<8x32xf32>
    %cst_65 = arith.constant 1.000000e+00 : f32
    %153 = vector.broadcast %cst_65 : f32 to vector<8x32xf32>
    %154 = arith.mulf %153, %144 : vector<8x32xf32>
    %155 = arith.subf %152, %154 : vector<8x32xf32>
    %cst_66 = arith.constant 5.000000e-01 : f32
    %156 = vector.broadcast %cst_66 : f32 to vector<8x32xf32>
    %157 = arith.mulf %155, %156 : vector<8x32xf32>
    %c1_67 = arith.constant 1 : index
    %c0_68 = arith.constant 0 : index
    %c0_69 = arith.constant 0 : index
    %158 = vector.load %arg7[%c1_67, %c0_68, %c0_69] : memref<3x32x8xf32, #tpu.memory_space<vmem>>, vector<1x32x8xf32>
    %159 = vector.shape_cast %158 : vector<1x32x8xf32> to vector<32x8xf32>
    %cst_70 = arith.constant dense<0.000000e+00> : vector<8x8xf32>
    %160 = tpu.matmul %157, %159, %cst_70 {dimension_numbers = #tpu.dot_dimension_numbers<[1], [0], [0], [1], [0, 0, 1, 1], [], []>} : vector<8x32xf32>, vector<32x8xf32>, vector<8x8xf32> -> vector<8x8xf32>
    %161 = arith.addf %149, %160 : vector<8x8xf32>
    %cst_71 = arith.constant 5.000000e+00 : f32
    %162 = vector.broadcast %cst_71 : f32 to vector<8x32xf32>
    %163 = arith.mulf %162, %143 : vector<8x32xf32>
    %164 = arith.mulf %163, %157 : vector<8x32xf32>
    %cst_72 = arith.constant 2.000000e+00 : f32
    %165 = vector.broadcast %cst_72 : f32 to vector<8x32xf32>
    %166 = arith.mulf %165, %143 : vector<8x32xf32>
    %167 = arith.subf %164, %166 : vector<8x32xf32>
    %cst_73 = arith.constant 0.333333343 : f32
    %168 = vector.broadcast %cst_73 : f32 to vector<8x32xf32>
    %169 = arith.mulf %167, %168 : vector<8x32xf32>
    %c2_74 = arith.constant 2 : index
    %c0_75 = arith.constant 0 : index
    %c0_76 = arith.constant 0 : index
    %170 = vector.load %arg7[%c2_74, %c0_75, %c0_76] : memref<3x32x8xf32, #tpu.memory_space<vmem>>, vector<1x32x8xf32>
    %171 = vector.shape_cast %170 : vector<1x32x8xf32> to vector<32x8xf32>
    %cst_77 = arith.constant dense<0.000000e+00> : vector<8x8xf32>
    %172 = tpu.matmul %169, %171, %cst_77 {dimension_numbers = #tpu.dot_dimension_numbers<[1], [0], [0], [1], [0, 0, 1, 1], [], []>} : vector<8x32xf32>, vector<32x8xf32>, vector<8x8xf32> -> vector<8x8xf32>
    %173 = arith.addf %161, %172 : vector<8x8xf32>
    %174 = arith.addf %127, %173 : vector<8x8xf32>
    %cst_78 = arith.constant dense<0.000000e+00> : vector<8xf32>
    %175 = vector.multi_reduction <add>, %174, %cst_78 [1] : vector<8x8xf32> to vector<8xf32>
    %176 = vector.shape_cast %175 : vector<8xf32> to vector<8x1xf32>
    %cst_79 = arith.constant 8.000000e+00 : f32
    %177 = vector.broadcast %cst_79 : f32 to vector<8x1xf32>
    %178 = arith.divf %176, %177 : vector<8x1xf32>
    %179 = vector.broadcast %178 : vector<8x1xf32> to vector<8x8xf32>
    %180 = arith.subf %174, %179 : vector<8x8xf32>
    %181 = arith.mulf %180, %180 : vector<8x8xf32>
    %cst_80 = arith.constant dense<0.000000e+00> : vector<8xf32>
    %182 = vector.multi_reduction <add>, %181, %cst_80 [1] : vector<8x8xf32> to vector<8xf32>
    %183 = vector.shape_cast %182 : vector<8xf32> to vector<8x1xf32>
    %cst_81 = arith.constant 8.000000e+00 : f32
    %184 = vector.broadcast %cst_81 : f32 to vector<8x1xf32>
    %185 = arith.divf %183, %184 : vector<8x1xf32>
    %cst_82 = arith.constant 9.99999974E-6 : f32
    %186 = vector.broadcast %cst_82 : f32 to vector<8x1xf32>
    %187 = arith.addf %185, %186 : vector<8x1xf32>
    %188 = math.rsqrt %187 : vector<8x1xf32>
    %189 = vector.broadcast %188 : vector<8x1xf32> to vector<8x8xf32>
    %190 = arith.mulf %180, %189 : vector<8x8xf32>
    %191 = vector.broadcast %102 : vector<1x8xf32> to vector<8x8xf32>
    %192 = arith.mulf %190, %191 : vector<8x8xf32>
    %193 = vector.broadcast %103 : vector<1x8xf32> to vector<8x8xf32>
    %194 = arith.addf %192, %193 : vector<8x8xf32>
    %195 = arith.negf %194 : vector<8x8xf32>
    %196 = math.exp %195 : vector<8x8xf32>
    %cst_83 = arith.constant 1.000000e+00 : f32
    %197 = vector.broadcast %cst_83 : f32 to vector<8x8xf32>
    %198 = arith.addf %197, %196 : vector<8x8xf32>
    %199 = arith.divf %197, %198 : vector<8x8xf32>
    %200 = arith.mulf %194, %199 : vector<8x8xf32>
    %c0_84 = arith.constant 0 : index
    %c0_85 = arith.constant 0 : index
    %201 = vector.load %arg11[%c0_84, %c0_85] : memref<8x8xf32, #tpu.memory_space<vmem>>, vector<8x8xf32>
    tpu.vector_store %arg11[%c0_84, %c0_85], %200 {strides = array<i32>} : memref<8x8xf32, #tpu.memory_space<vmem>>, vector<8x8xf32>,
    return
  }
}

</mosaic_0001>

<bundles_post_ra>
// kernel: tpu_custom_call.1
= control target key start
LH: loop header
LB: loop body
LE: loop exit
PB: predicated region body
PF: predicated region fallthrough
CT: control target
= control target key end

     0   :  { %v1174_v3 = vmov 0.0|0.0   ;;  %vm1175_vm0 = vmmov 0   ;;  %v1176_v5 = vmov 0.0   ;;  %s1419_s0 = inlined_call_operand.vmem [shape: f32[8,16], index: 0, kind: input, shape index: {}]   ;;  %s1420_s1 = inlined_call_operand.vmem [shape: f32[16,32], index: 1, kind: input, shape index: {}]   ;;  %s1421_s2 = inlined_call_operand.vmem [shape: f32[3,16,32], index: 2, kind: input, shape index: {}]   ;;  %s1422_s3 = inlined_call_operand.vmem [shape: f32[1,32], index: 3, kind: input, shape index: {}]   ;;  %s1423_s4 = inlined_call_operand.vmem [shape: f32[1,32], index: 4, kind: input, shape index: {}]   ;;  %s1424_s5 = inlined_call_operand.vmem [shape: f32[1,32], index: 5, kind: input, shape index: {}]   ;;  %s1425_s6 = inlined_call_operand.vmem [shape: f32[32,8], index: 6, kind: input, shape index: {}]   ;;  %s1426_s7 = inlined_call_operand.vmem [shape: f32[3,32,8], index: 7, kind: input, shape index: {}]   ;;  %s1427_s8 = inlined_call_operand.vmem [shape: f32[1,8], index: 8, kind: input, shape index: {}]   ;;  %s1428_s9 = inlined_call_operand.vmem [shape: f32[1,8], index: 9, kind: input, shape index: {}]   ;;  %s1429_s10 = inlined_call_operand.vmem [shape: f32[1,8], index: 10, kind: input, shape index: {}]   ;;  %s1430_s11 = inlined_call_operand.hbm [shape: f32[8,8], index: 11, kind: output, shape index: {}]  }
   0x1   :  { %v50_v0 = vld [vmem:[%s1420_s1] sm:$0xff]  ;;  %v51_v1 = vld [vmem:[%s1420_s1 + $0x8] sm:$0xff]  ;;  %1058 = vmatprep.subr.bf16.mxu0 %v1174_v3  ;;  %990 = vmatprep.mubr.msk.f32.mxu0 %vm1175_vm0, %v1176_v5 }
   0x2   :  { %v1247_v2 = vld [vmem:[%s1419_s0] sm:$0xff]  ;;  %v1059_v4 = vpack.c.bf16 %v51_v1, %v50_v0 }
   0x3   :  { %v922_v6 = vmul.f32 -1.442695, %v1247_v2 }
   0x4   :  { %16 = vsyncpa [#allocation3], 0  ;;  %1061 = vmatprep.subr.bf16.mxu1 %v1174_v3  ;;  %997 = vmatprep.mubr.msk.f32.mxu1 %vm1175_vm0, %v1176_v5  ;;  %vm52_vm1 = vcmask 130048   ;;  %vm126_vm2 = vcmask 261120   ;;  %v189_v41 = vld [vmem:[%s1421_s2] sm:$0xff]  ;;  %v190_v42 = vld [vmem:[%s1421_s2 + $0x8] sm:$0xff] }
   0x5   :  { %1060 = vmatpush3.bf16.msra.mxu0 %v1059_v4  ;;  %1122 = vpow2.f32 %v922_v6  ;;  %v158_v11 = vsel %vm52_vm1, %v1247_v2, inf  ;;  %v168_v12 = vsel %vm52_vm1, %v1247_v2, -inf  ;;  %v1062_v44 = vpack.c.bf16 %v190_v42, %v189_v41  ;;  %v927_v47 = vld [vmem:[%s1421_s2 + $0x10] sm:$0xff]  ;;  %v928_v48 = vld [vmem:[%s1421_s2 + $0x18] sm:$0xff]  ;;  %v930_v60 = vld [vmem:[%s1421_s2 + $0x20] sm:$0xff]  ;;  %s1177_s28 = smov [#allocation2]  }
   0x6   :  { %1064 = vmatprep.subr.bf16.mxu0 %v1174_v3  ;;  %159 = vmin.xlane.f32.xlu1 %v158_v11  ;;  %v1065_v49 = vpack.c.bf16 %v928_v48, %v927_v47  ;;  %v931_v61 = vld [vmem:[%s1421_s2 + $0x28] sm:$0xff]  ;;  %v934_v42 = vld [vmem:[%s1424_s5] ss:$0 sm:$0xff]  ;;  %vm557_vm3 = vcmask 64512   ;;  %s914_s29 = sshll.u32 %s1177_s28, 4  ;;  %s915_s29 = int_to_ptr.vmem [resolvable:$true] %s914_s29 }
   0x7   :  { %1063 = vmatpush3.bf16.msra.mxu1 %v1062_v44  ;;  %v1068_v0 = vpack.c.bf16 %v931_v61, %v930_v60  ;;  %p1155_p1 = scmp.lt.s32.totalorder %s915_s29, %s915_s29 }
   0x8   :  { %1067 = vmatprep.subr.bf16.mxu1 %v1174_v3 }
   0xa   :  { %169 = vmax.xlane.f32.xlu1 %v168_v12 }
   0xf   :  { %v1123_v7 = vpop.eup %1122 }
  0x10   :  { %v46_v8 = vadd.f32 1.0, %v1123_v7 }
  0x12   :  { %1124 = vrcp.f32 %v46_v8 }
  0x1c   :  { %v1125_v9 = vpop.eup %1124 }
  0x1d   :  { %v49_v10 = vmul.f32 %v1125_v9, %v1247_v2 }
  0x1f   :  { %991 = vmatmul.mubr.msk.f32.vlgmr.msra.gmra.mrb[0].mxu0 %vm52_vm1, %v49_v10 }
  0x20   :  { %1004 = vmatprep.mubr.msk.f32.mxu0 %vm1175_vm0, %v1176_v5  ;;  %1066 = vmatpush3.bf16.msra.mxu0 %v1065_v49 }
  0x21   :  { %1070 = vmatprep.subr.bf16.mxu0 %v1174_v3 }
  0x93   :  { %v160_v31 = vpop.xlane.xlu1 %159 }
  0x94   :  { %v161_v33 = vrot.slane %v160_v31, 4 }
  0x96   :  { %v162_v35 = vmin.f32 %v160_v31, %v161_v33  ;;  %v481_v31 = vld [vmem:[%s1425_s6 + $0x8] sm:$0xff] }
  0x97   :  { %v170_v32 = vpop.xlane.xlu1 %169 }
  0x98   :  { %v171_v34 = vrot.slane %v170_v32, 4  ;;  %v163_v37 = vrot.slane %v162_v35, 2 }
  0x9a   :  { %v172_v36 = vmax.f32 %v170_v32, %v171_v34  ;;  %v164_v40 = vmin.f32 %v162_v35, %v163_v37  ;;  %v482_v32 = vld [vmem:[%s1425_s6 + $0x10] sm:$0xff]  ;;  %v483_v34 = vld [vmem:[%s1425_s6 + $0x18] sm:$0xff] }
  0x9b   :  { %v1074_v35 = vpack.c.bf16 %v483_v34, %v482_v32  ;;  %v942_v32 = vld [vmem:[%s1426_s7 + $0x28] sm:$0xff] }
  0x9c   :  { %v173_v38 = vrot.slane %v172_v36, 2  ;;  %v165_v45 = vrot.slane %v164_v40, 1 }
  0x9e   :  { %v174_v43 = vmax.f32 %v172_v36, %v173_v38  ;;  %v166_v51 = vmin.f32 %v164_v40, %v165_v45  ;;  %v933_v40 = vld [vmem:[%s1423_s4] ss:$0 sm:$0xff] }
  0xa0   :  { %v175_v46 = vrot.slane %v174_v43, 1 }
  0xa2   :  { %v176_v52 = vmax.f32 %v174_v43, %v175_v46 }
  0xf2   :  { %v122_v13 = vpop.f32.mrb[0].mxu0 }
  0xf3   :  { %v992_v14 = vpop.f32.mrb[1].mxu0  ;;  %v127_v15 = vsel %vm126_vm2, %v122_v13, inf  ;;  %v137_v16 = vsel %vm126_vm2, %v122_v13, -inf }
  0xf4   :  { %128 = vmin.xlane.f32.xlu0 %v127_v15  ;;  %v925_v15 = vld [vmem:[%s1422_s3] ss:$0 sm:$0xff] }
  0xf8   :  { %138 = vmax.xlane.f32.xlu0 %v137_v16 }
 0x181   :  { %v129_v17 = vpop.xlane.xlu0 %128 }
 0x182   :  { %v130_v18 = vrot.slane %v129_v17, 4 }
 0x184   :  { %v131_v19 = vmin.f32 %v129_v17, %v130_v18 }
 0x185   :  { %v139_v20 = vpop.xlane.xlu0 %138 }
 0x186   :  { %v132_v21 = vrot.slane %v131_v19, 2  ;;  %v140_v22 = vrot.slane %v139_v20, 4 }
 0x188   :  { %v141_v23 = vmax.f32 %v139_v20, %v140_v22  ;;  %v133_v24 = vmin.f32 %v131_v19, %v132_v21 }
 0x18a   :  { %v142_v25 = vrot.slane %v141_v23, 2  ;;  %v134_v26 = vrot.slane %v133_v24, 1 }
 0x18c   :  { %v135_v27 = vmin.f32 %v133_v24, %v134_v26  ;;  %v143_v28 = vmax.f32 %v141_v23, %v142_v25 }
 0x18e   :  { %1094 = vpush %v135_v27  ;;  %v144_v29 = vrot.slane %v143_v28, 1 }
 0x190   :  { %v145_v30 = vmax.f32 %v143_v28, %v144_v29 }
 0x192   :  { %1096 = vpush %v145_v30  ;;  %v480_v30 = vld [vmem:[%s1425_s6] sm:$0xff] }
 0x193   :  { %v1071_v33 = vpack.c.bf16 %v481_v31, %v480_v30  ;;  %v941_v31 = vld [vmem:[%s1426_s7 + $0x20] sm:$0xff] }
 0x194   :  { %v1083_v34 = vpack.c.bf16 %v942_v32, %v941_v31 }
 0x1bf   :  { %s1267_s0 = spop %1094 }
 0x1c3   :  { %s1097_s1 = spop %1096 }
 0x1c4   :  { %s147_s23 = ssub.f32 %s1097_s1, %s1267_s0 }
 0x1c6   :  { %v148_v39 = vstv %s147_s23 }
 0x1c7   :  { %1126 = vrcp.f32 %v148_v39 }
 0x1d1   :  { %v1127_v50 = vpop.eup %1126 }
 0x1d2   :  { %1098 = vpush %v1127_v50 }
 0x1d3   :  { %1100 = vpush %v166_v51 }
 0x1d4   :  { %1102 = vpush %v176_v52 }
 0x203   :  { %s1099_s13 = spop %1098 }
 0x204   :  { %s151_s14 = smul.f32 2.0, %s1099_s13  ;;  %s1101_s15 = spop %1100 }
 0x205   :  { %s1103_s16 = spop %1102 }
 0x206   :  { %v152_v53 = vstv %s151_s14  ;;  %s154_s17 = smul.f32 %s1267_s0, %s151_s14  ;;  %s178_s18 = ssub.f32 %s1103_s16, %s1101_s15 }
 0x207   :  { %v153_v54 = vmul.f32 %v152_v53, %v122_v13 }
 0x208   :  { %s155_s19 = sadd.f32 1.0, %s154_s17  ;;  %v179_v55 = vstv %s178_s18 }
 0x209   :  { %1128 = vrcp.f32 %v179_v55 }
 0x20a   :  { %v156_v56 = vstv %s155_s19 }
 0x20b   :  { %v157_v57 = vsub.f32 %v153_v54, %v156_v56 }
 0x213   :  { %v1129_v58 = vpop.eup %1128 }
 0x214   :  { %1104 = vpush %v1129_v58 }
 0x245   :  { %s1105_s20 = spop %1104 }
 0x246   :  { %s182_s21 = smul.f32 2.0, %s1105_s20 }
 0x248   :  { %v183_v59 = vstv %s182_s21  ;;  %s185_s22 = smul.f32 %s1101_s15, %s182_s21 }
 0x249   :  { %v184_v62 = vmul.f32 %v183_v59, %v1247_v2 }
 0x24a   :  { %s186_s0 = sadd.f32 1.0, %s185_s22 }
 0x24c   :  { %v187_v63 = vstv %s186_s0 }
 0x24d   :  { %v188_v1 = vsub.f32 %v184_v62, %v187_v63 }
 0x24f   :  { %998 = vmatmul.mubr.msk.f32.vlgmr.msra.gmra.mrb[0].mxu1 %vm52_vm1, %v188_v1  ;;  %v271_v4 = vmul.f32 3.0, %v188_v1  ;;  %v352_v9 = vmul.f32 5.0, %v188_v1  ;;  %v354_v2 = vmul.f32 2.0, %v188_v1 }
 0x250   :  { %1069 = vmatpush3.bf16.msra.mxu1 %v1068_v0  ;;  %1011 = vmatprep.mubr.msk.f32.mxu1 %vm1175_vm0, %v1176_v5 }
 0x251   :  { %v272_v6 = vmul.f32 %v271_v4, %v188_v1  ;;  %1076 = vmatprep.subr.bf16.mxu1 %v1174_v3 }
 0x253   :  { %v926_v7 = vadd.f32 -1.0, %v272_v6 }
 0x255   :  { %v274_v8 = vmul.f32 0.5, %v926_v7 }
 0x257   :  { %1005 = vmatmul.mubr.msk.f32.vlgmr.msra.gmra.mrb[2].mxu0 %vm52_vm1, %v274_v8  ;;  %v353_v10 = vmul.f32 %v352_v9, %v274_v8 }
 0x258   :  { %1022 = vmatprep.mubr.msk.f32.mxu0 %vm1175_vm0, %v1176_v5  ;;  %1072 = vmatpush3.bf16.msra.mxu0 %v1071_v33 }
 0x259   :  { %v355_v11 = vsub.f32 %v353_v10, %v354_v2  ;;  %1073 = vmatprep.subr.bf16.mxu0 %v1174_v3 }
 0x25b   :  { %v356_v12 = vmul.f32 0.33333334, %v355_v11 }
 0x25c   :  { %1075 = vmatpush3.bf16.msra.mxu0 %v1074_v35  ;;  %v943_v35 = vld [vmem:[%s1426_s7 + $0x30] sm:$0xff] }
 0x25d   :  { %1012 = vmatmul.mubr.msk.f32.vlgmr.msra.gmra.mrb[2].mxu1 %vm52_vm1, %v356_v12  ;;  %1082 = vmatprep.subr.bf16.mxu0 %v1174_v3 }
 0x25e   :  { %1033 = vmatprep.mubr.msk.f32.mxu1 %vm1175_vm0, %v1176_v5 }
 0x322   :  { %v260_v13 = vpop.f32.mrb[0].mxu1 }
 0x323   :  { %v999_v14 = vpop.f32.mrb[1].mxu1  ;;  %v270_v16 = vadd.f32 %v925_v15, %v260_v13 }
 0x32a   :  { %v347_v17 = vpop.f32.mrb[2].mxu0 }
 0x32b   :  { %v351_v18 = vadd.f32 %v347_v17, %v270_v16  ;;  %v1006_v19 = vpop.f32.mrb[3].mxu0 }
 0x330   :  { %v429_v20 = vpop.f32.mrb[2].mxu1 }
 0x331   :  { %v433_v21 = vadd.f32 %v429_v20, %v351_v18  ;;  %v1013_v22 = vpop.f32.mrb[3].mxu1  ;;  %v620_v20 = vld [vmem:[%s1426_s7] sm:$0xff] }
 0x333   :  { %v434_v23 = vadd.f32 %v433_v21, %v157_v57  ;;  %v621_v21 = vld [vmem:[%s1426_s7 + $0x8] sm:$0xff] }
 0x335   :  { %v435_v24 = vsel %vm126_vm2, %v434_v23, 0.0 }
 0x336   :  { %436 = vadd.xlane.f32.xlu0 %v435_v24  ;;  %v1077_v24 = vpack.c.bf16 %v621_v21, %v620_v20 }
 0x338   :  { %1078 = vmatpush3.bf16.msra.mxu1 %v1077_v24 }
 0x339   :  { %1079 = vmatprep.subr.bf16.mxu1 %v1174_v3 }
 0x3c3   :  { %v437_v25 = vpop.xlane.xlu0 %436 }
 0x3c4   :  { %v439_v26 = vmul.f32 0.03125, %v437_v25 }
 0x3c6   :  { %v440_v27 = vsub.f32 %v434_v23, %v439_v26  ;;  %v622_v26 = vld [vmem:[%s1426_s7 + $0x10] sm:$0xff] }
 0x3c8   :  { %v441_v28 = vmul.f32 %v440_v27, %v440_v27 }
 0x3ca   :  { %v442_v29 = vsel %vm126_vm2, %v441_v28, 0.0 }
 0x3cb   :  { %443 = vadd.xlane.f32.xlu1 %v442_v29 }
 0x458   :  { %v444_v36 = vpop.xlane.xlu1 %443 }
 0x459   :  { %v445_v37 = vmul.f32 0.03125, %v444_v36  ;;  %v944_v36 = vld [vmem:[%s1426_s7 + $0x38] sm:$0xff] }
 0x45b   :  { %v446_v38 = vadd.f32 1e-05, %v445_v37  ;;  %v1086_v37 = vpack.c.bf16 %v944_v36, %v943_v35 }
 0x45d   :  { %1130 = vrsqrt.f32 %v446_v38 }
 0x467   :  { %v1131_v39 = vpop.eup %1130 }
 0x468   :  { %v448_v41 = vmul.f32 %v1131_v39, %v440_v27  ;;  %v623_v27 = vld [vmem:[%s1426_s7 + $0x18] sm:$0xff] }
 0x469   :  { %v1080_v29 = vpack.c.bf16 %v623_v27, %v622_v26 }
 0x46a   :  { %v455_v43 = vmul.f32 %v933_v40, %v448_v41 }
 0x46b   :  { %1081 = vmatpush3.bf16.msra.mxu1 %v1080_v29 }
 0x46c   :  { %v462_v44 = vadd.f32 %v934_v42, %v455_v43  ;;  %1088 = vmatprep.subr.bf16.mxu1 %v1174_v3 }
 0x46e   :  { %v935_v45 = vmul.f32 -1.442695, %v462_v44 }
 0x470   :  { %1132 = vpow2.f32 %v935_v45 }
 0x47a   :  { %v1133_v46 = vpop.eup %1132 }
 0x47b   :  { %v466_v47 = vadd.f32 1.0, %v1133_v46 }
 0x47d   :  { %1134 = vrcp.f32 %v466_v47 }
 0x487   :  { %v1135_v48 = vpop.eup %1134 }
 0x488   :  { %v1327_v49 = vmul.f32 %v1135_v48, %v462_v44  ;;  %v946_v48 = vld [vmem:[%s1426_s7 + $0x40] sm:$0xff] }
 0x48a   :  { %v936_v50 = vmul.f32 -1.442695, %v1327_v49  ;;  %v599_v59 = vsel %vm126_vm2, %v1327_v49, -inf  ;;  %v589_v60 = vsel %vm126_vm2, %v1327_v49, inf }
 0x48c   :  { %1136 = vpow2.f32 %v936_v50  ;;  %v947_v50 = vld [vmem:[%s1426_s7 + $0x48] sm:$0xff] }
 0x496   :  { %v1137_v51 = vpop.eup %1136 }
 0x497   :  { %v476_v52 = vadd.f32 1.0, %v1137_v51 }
 0x499   :  { %1138 = vrcp.f32 %v476_v52 }
 0x4a3   :  { %v1139_v53 = vpop.eup %1138 }
 0x4a4   :  { %v479_v54 = vmul.f32 %v1139_v53, %v1327_v49  ;;  %v1089_v53 = vpack.c.bf16 %v947_v50, %v946_v48 }
 0x4a6   :  { %1023 = vmatmul.mubr.msk.f32.vlgmr.msra.gmra.mrb[4].mxu0 %vm126_vm2, %v479_v54 }
 0x4a7   :  { %1044 = vmatprep.mubr.msk.f32.mxu0 %vm1175_vm0, %v1176_v5  ;;  %1084 = vmatpush3.bf16.msra.mxu0 %v1083_v34 }
 0x4a8   :  { %1085 = vmatprep.subr.bf16.mxu0 %v1174_v3 }
 0x4ab   :  { %1087 = vmatpush3.bf16.msra.mxu0 %v1086_v37 }
 0x579   :  { %v1334_v55 = vpop.f32.mrb[4].mxu0 }
 0x57a   :  { %v1024_v56 = vpop.f32.mrb[5].mxu0  ;;  %v568_v57 = vsel %vm557_vm3, %v1334_v55, -inf  ;;  %v558_v58 = vsel %vm557_vm3, %v1334_v55, inf }
 0x57b   :  { %569 = vmax.xlane.f32.xlu1 %v568_v57  ;;  %559 = vmin.xlane.f32.xlu0 %v558_v58  ;;  %v949_v56 = vld [vmem:[%s1426_s7 + $0x58] sm:$0xff] }
 0x57f   :  { %600 = vmax.xlane.f32.xlu1 %v599_v59  ;;  %590 = vmin.xlane.f32.xlu0 %v589_v60 }
 0x608   :  { %v570_v61 = vpop.xlane.xlu1 %569  ;;  %v560_v62 = vpop.xlane.xlu0 %559 }
 0x609   :  { %v571_v63 = vrot.slane %v570_v61, 4  ;;  %v561_v0 = vrot.slane %v560_v62, 4 }
 0x60b   :  { %v572_v1 = vmax.f32 %v570_v61, %v571_v63  ;;  %v562_v4 = vmin.f32 %v560_v62, %v561_v0 }
 0x60c   :  { %v591_v13 = vpop.xlane.xlu0 %590  ;;  %v601_v14 = vpop.xlane.xlu1 %600 }
 0x60d   :  { %v573_v6 = vrot.slane %v572_v1, 2  ;;  %v563_v7 = vrot.slane %v562_v4, 2  ;;  %v592_v15 = vrot.slane %v591_v13, 4  ;;  %v602_v16 = vrot.slane %v601_v14, 4 }
 0x60f   :  { %v564_v8 = vmin.f32 %v562_v4, %v563_v7  ;;  %v574_v9 = vmax.f32 %v572_v1, %v573_v6  ;;  %v593_v17 = vmin.f32 %v591_v13, %v592_v15  ;;  %v603_v18 = vmax.f32 %v601_v14, %v602_v16 }
 0x611   :  { %v565_v10 = vrot.slane %v564_v8, 1  ;;  %v575_v2 = vrot.slane %v574_v9, 1  ;;  %v594_v19 = vrot.slane %v593_v17, 2  ;;  %v604_v22 = vrot.slane %v603_v18, 2 }
 0x613   :  { %v566_v11 = vmin.f32 %v564_v8, %v565_v10  ;;  %v576_v12 = vmax.f32 %v574_v9, %v575_v2  ;;  %v595_v25 = vmin.f32 %v593_v17, %v594_v19  ;;  %v605_v28 = vmax.f32 %v603_v18, %v604_v22 }
 0x615   :  { %1106 = vpush %v566_v11  ;;  %v596_v30 = vrot.slane %v595_v25, 1  ;;  %v606_v33 = vrot.slane %v605_v28, 1 }
 0x616   :  { %1108 = vpush %v576_v12 }
 0x617   :  { %v597_v39 = vmin.f32 %v595_v25, %v596_v30  ;;  %v607_v40 = vmax.f32 %v605_v28, %v606_v33  ;;  %v952_v25 = vld [vmem:[%s1429_s10] ss:$0 sm:$0xff] }
 0x646   :  { %s1344_s4 = spop %1106 }
 0x647   :  { %s1109_s5 = spop %1108 }
 0x648   :  { %s578_s6 = ssub.f32 %s1109_s5, %s1344_s4 }
 0x64a   :  { %v579_v23 = vstv %s578_s6 }
 0x64b   :  { %1140 = vrcp.f32 %v579_v23  ;;  %v951_v23 = vld [vmem:[%s1428_s9] ss:$0 sm:$0xff]  ;;  %s1150_s9 = scalar_lea.vmem %s915_s29, 128 }
 0x64c   :  { %p1151_p0 = scmp.ne.s32.totalorder %s915_s29, %s1150_s9  ;;  %p1156_p2 = scmp.lt.s32.totalorder %s1150_s9, %s1150_s9 }
 0x64e   :  { %p1157_p3 = por %p1156_p2, %p1155_p1 }
 0x650   :  { %p1158_p4 = pnand %p1157_p3, %p1151_p0 }
 0x655   :  { %v1141_v38 = vpop.eup %1140 }
 0x656   :  { %1110 = vpush %v1141_v38 }
 0x657   :  { %1112 = vpush %v597_v39 }
 0x658   :  { %1114 = vpush %v607_v40 }
 0x687   :  { %s1111_s12 = spop %1110 }
 0x688   :  { %s582_s13 = smul.f32 2.0, %s1111_s12  ;;  %s1113_s14 = spop %1112 }
 0x689   :  { %s1115_s15 = spop %1114 }
 0x68a   :  { %v583_v41 = vstv %s582_s13  ;;  %s585_s16 = smul.f32 %s1344_s4, %s582_s13  ;;  %s609_s17 = ssub.f32 %s1115_s15, %s1113_s14 }
 0x68b   :  { %v584_v42 = vmul.f32 %v583_v41, %v1334_v55  ;;  %v948_v55 = vld [vmem:[%s1426_s7 + $0x50] sm:$0xff] }
 0x68c   :  { %s586_s18 = sadd.f32 1.0, %s585_s16  ;;  %v610_v43 = vstv %s609_s17  ;;  %v1092_v58 = vpack.c.bf16 %v949_v56, %v948_v55 }
 0x68d   :  { %1142 = vrcp.f32 %v610_v43 }
 0x68e   :  { %v587_v44 = vstv %s586_s18 }
 0x68f   :  { %v588_v45 = vsub.f32 %v584_v42, %v587_v44 }
 0x697   :  { %v1143_v46 = vpop.eup %1142 }
 0x698   :  { %1116 = vpush %v1143_v46 }
 0x6c9   :  { %s1117_s5 = spop %1116 }
 0x6ca   :  { %s613_s6 = smul.f32 2.0, %s1117_s5 }
 0x6cc   :  { %v614_v47 = vstv %s613_s6  ;;  %s616_s19 = smul.f32 %s1113_s14, %s613_s6 }
 0x6cd   :  { %v615_v51 = vmul.f32 %v614_v47, %v1327_v49 }
 0x6ce   :  { %s617_s1 = sadd.f32 1.0, %s616_s19 }
 0x6d0   :  { %v618_v52 = vstv %s617_s1 }
 0x6d1   :  { %v619_v54 = vsub.f32 %v615_v51, %v618_v52 }
 0x6d3   :  { %1034 = vmatmul.mubr.msk.f32.vlgmr.msra.gmra.mrb[4].mxu1 %vm126_vm2, %v619_v54  ;;  %v704_v57 = vmul.f32 3.0, %v619_v54  ;;  %v787_v61 = vmul.f32 5.0, %v619_v54  ;;  %v789_v63 = vmul.f32 2.0, %v619_v54 }
 0x6d4   :  { %1090 = vmatpush3.bf16.msra.mxu1 %v1089_v53  ;;  %1055 = vmatprep.mubr.msk.f32.mxu1 %vm1175_vm0, %v1176_v5  ;;  %v939_v5 = vld [vmem:[%s1427_s8] ss:$0 sm:$0xff] }
 0x6d5   :  { %v705_v49 = vmul.f32 %v704_v57, %v619_v54  ;;  %1091 = vmatprep.subr.bf16.mxu1 %v1174_v3 }
 0x6d7   :  { %v940_v59 = vadd.f32 -1.0, %v705_v49 }
 0x6d8   :  { %1093 = vmatpush3.bf16.msra.mxu1 %v1092_v58 }
 0x6d9   :  { %v707_v60 = vmul.f32 0.5, %v940_v59 }
 0x6db   :  { %1045 = vmatmul.mubr.msk.f32.vlgmr.msra.gmra.mrb[6].mxu0 %vm126_vm2, %v707_v60  ;;  %v788_v62 = vmul.f32 %v787_v61, %v707_v60 }
 0x6dd   :  { %v790_v0 = vsub.f32 %v788_v62, %v789_v63 }
 0x6df   :  { %v791_v1 = vmul.f32 0.33333334, %v790_v0 }
 0x6e1   :  { %1056 = vmatmul.mubr.msk.f32.vlgmr.msra.gmra.mrb[6].mxu1 %vm126_vm2, %v791_v1 }
 0x7a6   :  { %v693_v4 = vpop.f32.mrb[4].mxu1 }
 0x7a7   :  { %v1035_v6 = vpop.f32.mrb[5].mxu1  ;;  %v703_v7 = vadd.f32 %v939_v5, %v693_v4 }
 0x7ae   :  { %v782_v3 = vpop.f32.mrb[6].mxu0 }
 0x7af   :  { %v786_v8 = vadd.f32 %v782_v3, %v703_v7  ;;  %v1046_v9 = vpop.f32.mrb[7].mxu0 }
 0x7b4   :  { %v866_v10 = vpop.f32.mrb[6].mxu1 }
 0x7b5   :  { %v870_v2 = vadd.f32 %v866_v10, %v786_v8  ;;  %v1057_v11 = vpop.f32.mrb[7].mxu1 }
 0x7b7   :  { %v871_v12 = vadd.f32 %v870_v2, %v588_v45 }
 0x7b9   :  { %v872_v13 = vsel %vm557_vm3, %v871_v12, 0.0 }
 0x7ba   :  { %873 = vadd.xlane.f32.xlu0 %v872_v13 }
 0x847   :  { %v874_v14 = vpop.xlane.xlu0 %873 }
 0x848   :  { %v876_v15 = vmul.f32 0.125, %v874_v14 }
 0x84a   :  { %v877_v16 = vsub.f32 %v871_v12, %v876_v15 }
 0x84c   :  { %v878_v17 = vmul.f32 %v877_v16, %v877_v16 }
 0x84e   :  { %v879_v18 = vsel %vm557_vm3, %v878_v17, 0.0 }
 0x84f   :  { %880 = vadd.xlane.f32.xlu1 %v879_v18 }
 0x8dc   :  { %v881_v19 = vpop.xlane.xlu1 %880 }
 0x8dd   :  { %v882_v20 = vmul.f32 0.125, %v881_v19 }
 0x8df   :  { %v883_v21 = vadd.f32 1e-05, %v882_v20 }
 0x8e1   :  { %1144 = vrsqrt.f32 %v883_v21 }
 0x8eb   :  { %v1145_v22 = vpop.eup %1144 }
 0x8ec   :  { %v885_v24 = vmul.f32 %v1145_v22, %v877_v16 }
 0x8ee   :  { %v892_v26 = vmul.f32 %v951_v23, %v885_v24 }
 0x8f0   :  { %v899_v27 = vadd.f32 %v952_v25, %v892_v26 }
 0x8f2   :  { %v953_v28 = vmul.f32 -1.442695, %v899_v27 }
 0x8f4   :  { %1146 = vpow2.f32 %v953_v28 }
 0x8fe   :  { %v1147_v29 = vpop.eup %1146 }
 0x8ff   :  { %v903_v30 = vadd.f32 1.0, %v1147_v29 }
 0x901   :  { %1148 = vrcp.f32 %v903_v30 }
 0x90b   :  { %v1149_v31 = vpop.eup %1148 }
 0x90c   :  { %v906_v32 = vmul.f32 %v1149_v31, %v899_v27 }
 0x90e   :  { %907 = vst.msk [vmem:[#allocation2] sm:$0xff] %vm557_vm3, %v906_v32 }
 0x90f   :  { %1161 = shalt.err (!%p1158_p4)
}
 0x910   :  { %s1162_s12 = scalar_lea.hbm %s1430_s11, 128 }
 0x911   :  { %p1163_p5 = scmp.ne.s32.totalorder %s1430_s11, %s1162_s12  ;;  %p1166_p6 = scmp.lt.u32.totalorder %s1162_s12, %s1430_s11 }
 0x913   :  { %p1168_p7 = pnand %p1166_p6, %p1163_p5 }
 0x915   :  { %1171 = shalt.err (!%p1168_p7)
}
 0x916   :  { %917 = dma.vmem_to_hbm [thread:$0]  %s915_s29, 128, %s1430_s11, [#allocation3]  }
 0x917   :  { %1172 = dma.done.wait [#allocation3], 128  }
 0x918   :  { %1173 = vsyncadd [#allocation3], 4294967168 }
 0x919   :  { %921 = vsyncpa [#allocation3], 1 }

</bundles_post_ra>
